<compile_context>
chip_gen: v7x
topology: tpu7x:2x2x1
jax: 0.10.0
libtpu: 0.0.40
codegen_flags: <defaults>
</compile_context>

<pallas_src>
import numpy as np
import jax
import jax.numpy as jnp
from jax.experimental import pallas as pl
from jax.experimental.pallas import tpu as pltpu

# ----------------------- problem sizes (small, consistent with the module) ----
B = 16                                   # batch
NF = 16                                  # num_features
ENC_DIMS = [NF, 64, 32]                  # encoder_dimensions
DEC_DIMS = [32, 64, NF]                  # decoder_dimensions (last == num_features)
MLP_DIMS = [NF + ENC_DIMS[-1], 64, 32]   # [num_features + enc[-1]] + mlp_dimensions
NUM_LABELS = 8
BN_EPS = 1e-5

E1, E2 = ENC_DIMS[1], ENC_DIMS[2]        # 64, 32
D1, D2 = DEC_DIMS[1], DEC_DIMS[2]        # 64, 16
M1, M2 = MLP_DIMS[1], MLP_DIMS[2]        # 64, 32
LANES = 128

# Row offsets inside the packed weight slab (all multiples of 8 / sublane-aligned).
R_WA = 0                                 # (NF, 128)  = [enc_L1' | mlp_L1_x]
R_WE2 = R_WA + NF                        # (E1, E2)   enc L2 (folded)
R_WB = R_WE2 + E1                        # (E2, 128)  = [dec_L1' | mlp_L1_enc]
R_WD2 = R_WB + E2                        # (D1, NF)   dec L2
R_WM2 = R_WD2 + D1                       # (M1, M2)   mlp L2
R_WP = R_WM2 + M1                        # (NF+M2, 2*NUM_LABELS) block-diag proj heads
W_ROWS = R_WP + NF + M2                  # 288 total rows

# Bias slab rows.
B_SCALE0, B_SHIFT0, B_A, B_E2, B_B, B_D2, B_M2, B_P = range(8)

# Activation slab lane layout: [ x (NF) | y (NUM_LABELS) | y (NUM_LABELS) | 0 pad ].
L_Y0 = NF
L_Y1 = NF + 2 * NUM_LABELS

# Output slab: rows 0..B-1 = X_bn (lane-padded to 128); row B lanes 0..2 = losses.
OUT_ROWS = B + 8                         # 24 (sublane-aligned)


# ------------------------------- kernel helpers -------------------------------
def _silu(x):
    return x * jax.nn.sigmoid(x)


# ----------------------------------- kernel -----------------------------------
def autoencoder_kernel(act_ref, w_ref, b_ref, out_ref):
    act = act_ref[...]                                    # (B, 128) = [x | y | y | 0]

    # Input BatchNorm1d (eval, folded to scale/shift); GaussianNoise = identity.
    # scale/shift rows are zero beyond NF, so xb_full is exactly 0 past lane NF
    # -> usable directly as the lane-dense X_bn output rows.
    xb_full = (act * b_ref[B_SCALE0:B_SCALE0 + 1, :]
               + b_ref[B_SHIFT0:B_SHIFT0 + 1, :])         # (B, 128)
    xb = xb_full[:, :NF]                                  # (B, NF)
    yy = act[:, L_Y0:L_Y1]                                # (B, 2*NUM_LABELS) = [y | y]

    # ---- Stage A: xb @ [enc_L1' | mlp_L1_x]  (one 128-lane matmul) ----
    ha = jnp.dot(xb, w_ref[R_WA:R_WA + NF, :],
                 preferred_element_type=jnp.float32) + b_ref[B_A:B_A + 1, :]
    h = _silu(ha[:, :E1])                                 # encoder L1 (BN folded)
    mlp_x = ha[:, E1:]                                    # MLP L1 partial (xb half, has bias)

    # ---- Encoder L2 (BN folded) ----
    enc = _silu(jnp.dot(h, w_ref[R_WE2:R_WE2 + E1, 0:E2],
                        preferred_element_type=jnp.float32)
                + b_ref[B_E2:B_E2 + 1, 0:E2])

    # ---- Stage B: enc @ [dec_L1' | mlp_L1_enc]  (one 128-lane matmul) ----
    hb = jnp.dot(enc, w_ref[R_WB:R_WB + E2, :],
                 preferred_element_type=jnp.float32) + b_ref[B_B:B_B + 1, :]
    d = _silu(hb[:, :D1])                                 # decoder L1 (BN folded)
    mh = _silu(mlp_x + hb[:, D1:])                        # MLP L1 (bias already in mlp_x)

    # ---- Decoder L2 (no BN) ----
    dec = jnp.dot(d, w_ref[R_WD2:R_WD2 + D1, 0:NF],
                  preferred_element_type=jnp.float32) + b_ref[B_D2:B_D2 + 1, 0:NF]

    # ---- MLP L2 ----
    mlp_out = _silu(jnp.dot(mh, w_ref[R_WM2:R_WM2 + M1, 0:M2],
                            preferred_element_type=jnp.float32)
                    + b_ref[B_M2:B_M2 + 1, 0:M2])

    # ---- Fused projection heads: [dec | mlp_out] @ blockdiag(dp_w, mp_w) ----
    lhs = jnp.concatenate([dec, mlp_out], axis=-1)        # (B, NF + M2)
    z = (jnp.dot(lhs, w_ref[R_WP:R_WP + NF + M2, 0:2 * NUM_LABELS],
                 preferred_element_type=jnp.float32)
         + b_ref[B_P:B_P + 1, 0:2 * NUM_LABELS])

    # ---- losses (stable BCE-with-logits, one elementwise pass for both heads) ----
    terms = jnp.maximum(z, 0.0) - z * yy + jax.nn.softplus(-jnp.abs(z))
    lane = jax.lax.broadcasted_iota(jnp.int32, terms.shape, 1)
    inv_n = 1.0 / (B * NUM_LABELS)                        # compile-time constant
    ae_sum = jnp.sum(jnp.where(lane < NUM_LABELS, terms, 0.0))
    tot_sum = jnp.sum(terms)
    ae_loss = ae_sum * inv_n
    mlp_loss = (tot_sum - ae_sum) * inv_n
    recon = jnp.sum((dec - xb) ** 2) * (1.0 / (B * NF))

    # ---- single lane-dense output slab ----
    out_ref[0:B, :] = xb_full
    li = jax.lax.broadcasted_iota(jnp.int32, (OUT_ROWS - B, LANES), 1)
    out_ref[B:OUT_ROWS, :] = (jnp.where(li == 0, recon, 0.0)
                              + jnp.where(li == 1, ae_loss, 0.0)
                              + jnp.where(li == 2, mlp_loss, 0.0))


# -------------------------------- wrapper -------------------------------------
@jax.jit
def autoencoder_forward(x, y, w_slab, b_slab):
    # Pack x and (duplicated) y into one lane-dense activation slab.
    act = jnp.pad(jnp.concatenate([x, y, y], axis=1),
                  ((0, 0), (0, LANES - NF - 2 * NUM_LABELS)))
    vspec = pl.BlockSpec(memory_space=pltpu.MemorySpace.VMEM)
    out = pl.pallas_call(
        autoencoder_kernel,
        out_shape=jax.ShapeDtypeStruct((OUT_ROWS, LANES), jnp.float32),
        in_specs=[vspec, vspec, vspec],
        out_specs=vspec,
    )(act, w_slab, b_slab)
    xb = out[:B, :NF]                                     # X after input BN (+noise=id)
    return xb, (out[B, 0], out[B, 1], out[B, 2])          # (recon, ae, mlp) losses


# ---------------- host-side parameter folding & packing -----------------------
def pack_params(p):
    (bn0_g, bn0_b, bn0_m, bn0_v,
     e1_w, e1_b, e1_g, e1_bb, e1_m, e1_v,
     e2_w, e2_b, e2_g, e2_bb, e2_m, e2_v,
     d1_w, d1_b, d1_g, d1_bb, d1_m, d1_v,
     d2_w, d2_b, m1_w, m1_b, m2_w, m2_b, dp_w, dp_b, mp_w, mp_b) = p

    def fold(w, b, g, beta, m, v):
        s = g * jax.lax.rsqrt(v + BN_EPS)        # (1, out)
        return w * s, (b - m) * s + beta

    e1_wf, e1_bf = fold(e1_w, e1_b, e1_g, e1_bb, e1_m, e1_v)
    e2_wf, e2_bf = fold(e2_w, e2_b, e2_g, e2_bb, e2_m, e2_v)
    d1_wf, d1_bf = fold(d1_w, d1_b, d1_g, d1_bb, d1_m, d1_v)

    scale0 = bn0_g * jax.lax.rsqrt(bn0_v + BN_EPS)
    shift0 = bn0_b - bn0_m * scale0

    # fused stage weights / biases
    w_a = jnp.concatenate([e1_wf, m1_w[:NF, :]], axis=1)           # (NF, 128)
    b_a = jnp.concatenate([e1_bf, m1_b], axis=1)                   # (1, 128)
    w_b = jnp.concatenate([d1_wf, m1_w[NF:, :]], axis=1)           # (E2, 128)
    b_b = jnp.concatenate([d1_bf, jnp.zeros_like(m1_b)], axis=1)   # (1, 128)

    # block-diagonal fused projection head
    w_p = jnp.zeros((NF + M2, 2 * NUM_LABELS), jnp.float32)
    w_p = w_p.at[:NF, :NUM_LABELS].set(dp_w)
    w_p = w_p.at[NF:, NUM_LABELS:].set(mp_w)
    b_p = jnp.concatenate([dp_b, mp_b], axis=1)                    # (1, 16)

    def pad_lanes(a):
        return jnp.pad(a, ((0, 0), (0, LANES - a.shape[1])))

    w_slab = jnp.concatenate([
        pad_lanes(w_a),        # rows R_WA  : R_WA  + NF
        pad_lanes(e2_wf),      # rows R_WE2 : R_WE2 + E1
        pad_lanes(w_b),        # rows R_WB  : R_WB  + E2
        pad_lanes(d2_w),       # rows R_WD2 : R_WD2 + D1
        pad_lanes(m2_w),       # rows R_WM2 : R_WM2 + M1
        pad_lanes(w_p),        # rows R_WP  : R_WP  + NF + M2
    ], axis=0)                                                     # (288, 128)
    assert w_slab.shape == (W_ROWS, LANES)

    b_slab = jnp.concatenate([
        pad_lanes(scale0), pad_lanes(shift0), pad_lanes(b_a), pad_lanes(e2_bf),
        pad_lanes(b_b), pad_lanes(d2_b), pad_lanes(m2_b), pad_lanes(b_p),
    ], axis=0)                                                     # (8, 128)
    assert b_slab.shape == (8, LANES)

    return w_slab, b_slab


# ----------------------- deterministic parameter init -------------------------
def _linear(key, fan_in, fan_out):
    k1, k2 = jax.random.split(key)
    bound = 1.0 / np.sqrt(fan_in)
    w = jax.random.uniform(k1, (fan_in, fan_out), jnp.float32, -bound, bound)
    b = jax.random.uniform(k2, (1, fan_out), jnp.float32, -bound, bound)
    return w, b


def _bn(key, dim):
    k1, k2, k3, k4 = jax.random.split(key, 4)
    g = 1.0 + 0.1 * jax.random.normal(k1, (1, dim), jnp.float32)
    b = 0.1 * jax.random.normal(k2, (1, dim), jnp.float32)
    m = 0.1 * jax.random.normal(k3, (1, dim), jnp.float32)
    v = jax.random.uniform(k4, (1, dim), jnp.float32, 0.5, 1.5)
    return g, b, m, v


def make_params(key):
    ks = list(jax.random.split(key, 16))
    p = []
    p += list(_bn(ks[0], NF))                              # input_bn
    p += list(_linear(ks[1], ENC_DIMS[0], ENC_DIMS[1]))    # enc L1
    p += list(_bn(ks[2], ENC_DIMS[1]))
    p += list(_linear(ks[3], ENC_DIMS[1], ENC_DIMS[2]))    # enc L2
    p += list(_bn(ks[4], ENC_DIMS[2]))
    p += list(_linear(ks[5], DEC_DIMS[0], DEC_DIMS[1]))    # dec L1
    p += list(_bn(ks[6], DEC_DIMS[1]))
    p += list(_linear(ks[7], DEC_DIMS[1], DEC_DIMS[2]))    # dec L2 (no BN)
    p += list(_linear(ks[8], MLP_DIMS[0], MLP_DIMS[1]))    # mlp L1
    p += list(_linear(ks[9], MLP_DIMS[1], MLP_DIMS[2]))    # mlp L2
    p += list(_linear(ks[10], DEC_DIMS[-1], NUM_LABELS))   # decoder_projection_head
    p += list(_linear(ks[11], MLP_DIMS[-1], NUM_LABELS))   # mlp_projection_head
    return p


# ----------------------------- pure-JAX reference -----------------------------
def _bn_eval(x, g, b, m, v):
    return (x - m) * jax.lax.rsqrt(v + BN_EPS) * g + b


def _bce_with_logits_mean(z, y):
    return jnp.mean(jnp.maximum(z, 0.0) - z * y + jnp.log1p(jnp.exp(-jnp.abs(z))))


def reference_forward(x, y, p):
    (bn0_g, bn0_b, bn0_m, bn0_v,
     e1_w, e1_b, e1_g, e1_bb, e1_m, e1_v,
     e2_w, e2_b, e2_g, e2_bb, e2_m, e2_v,
     d1_w, d1_b, d1_g, d1_bb, d1_m, d1_v,
     d2_w, d2_b, m1_w, m1_b, m2_w, m2_b, dp_w, dp_b, mp_w, mp_b) = p
    xb = _bn_eval(x, bn0_g, bn0_b, bn0_m, bn0_v)
    h = _silu(_bn_eval(xb @ e1_w + e1_b, e1_g, e1_bb, e1_m, e1_v))
    enc = _silu(_bn_eval(h @ e2_w + e2_b, e2_g, e2_bb, e2_m, e2_v))
    d = _silu(_bn_eval(enc @ d1_w + d1_b, d1_g, d1_bb, d1_m, d1_v))
    dec = d @ d2_w + d2_b
    mlp_in = jnp.concatenate([xb, enc], axis=-1)
    mh = _silu(mlp_in @ m1_w + m1_b)
    mlp_out = _silu(mh @ m2_w + m2_b)
    recon = jnp.mean((dec - xb) ** 2)
    ae = _bce_with_logits_mean(dec @ dp_w + dp_b, y)
    ml = _bce_with_logits_mean(mlp_out @ mp_w + mp_b, y)
    return xb, recon, ae, ml


# ----------------------------------- main --------------------------------------
if __name__ == "__main__":
    key = jax.random.PRNGKey(0)
    kx, ky, kp = jax.random.split(key, 3)
    x = jax.random.normal(kx, (B, NF), jnp.float32)
    y = jax.random.bernoulli(ky, 0.5, (B, NUM_LABELS)).astype(jnp.float32)
    params = make_params(kp)
    w_slab, b_slab = pack_params(params)

    xb, (recon, ae, ml) = autoencoder_forward(x, y, w_slab, b_slab)
    jax.block_until_ready((xb, recon, ae, ml))

    # correctness check against pure-JAX reference (unfolded parameters)
    rxb, rrecon, rae, rml = reference_forward(x, y, params)
    assert np.allclose(np.asarray(xb), np.asarray(rxb), rtol=1e-5, atol=1e-5)
    assert np.allclose(float(recon), float(rrecon), rtol=1e-5, atol=1e-5)
    assert np.allclose(float(ae), float(rae), rtol=1e-5, atol=1e-5)
    assert np.allclose(float(ml), float(rml), rtol=1e-5, atol=1e-5)

    print("KERNEL_OK")
</pallas_src>

<mosaic_0001>
module attributes {stable_mosaic.version = 11 : i64} {
  func.func @autoencoder_kernel(%arg0: memref<16x128xf32, #tpu.memory_space<vmem>>, %arg1: memref<288x128xf32, #tpu.memory_space<vmem>>, %arg2: memref<8x128xf32, #tpu.memory_space<vmem>>, %arg3: memref<24x128xf32, #tpu.memory_space<vmem>>) attributes {dimension_semantics = [], scalar_prefetch = 0 : i64, scratch_operands = 0 : i64, tpu.core_type = #tpu.core_type<tc>} {
    %c0 = arith.constant 0 : index
    %c0_0 = arith.constant 0 : index
    %0 = vector.load %arg0[%c0, %c0_0] : memref<16x128xf32, #tpu.memory_space<vmem>>, vector<16x128xf32>
    %c0_1 = arith.constant 0 : index
    %c0_2 = arith.constant 0 : index
    %1 = vector.load %arg2[%c0_1, %c0_2] : memref<8x128xf32, #tpu.memory_space<vmem>>, vector<1x128xf32>
    %2 = vector.broadcast %1 : vector<1x128xf32> to vector<16x128xf32>
    %3 = arith.mulf %0, %2 : vector<16x128xf32>
    %c1 = arith.constant 1 : index
    %c0_3 = arith.constant 0 : index
    %4 = vector.load %arg2[%c1, %c0_3] : memref<8x128xf32, #tpu.memory_space<vmem>>, vector<1x128xf32>
    %5 = vector.broadcast %4 : vector<1x128xf32> to vector<16x128xf32>
    %6 = arith.addf %3, %5 : vector<16x128xf32>
    %7 = vector.extract_strided_slice %6 {offsets = [0, 0], sizes = [16, 16], strides = [1, 1]} : vector<16x128xf32> to vector<16x16xf32>
    %8 = vector.extract_strided_slice %0 {offsets = [0, 16], sizes = [16, 16], strides = [1, 1]} : vector<16x128xf32> to vector<16x16xf32>
    %c0_4 = arith.constant 0 : index
    %c0_5 = arith.constant 0 : index
    %9 = vector.load %arg1[%c0_4, %c0_5] : memref<288x128xf32, #tpu.memory_space<vmem>>, vector<16x128xf32>
    %cst = arith.constant dense<0.000000e+00> : vector<16x128xf32>
    %10 = tpu.matmul %7, %9, %cst {dimension_numbers = #tpu.dot_dimension_numbers<[1], [0], [0], [1], [0, 0, 1, 1], [], []>} : vector<16x16xf32>, vector<16x128xf32>, vector<16x128xf32> -> vector<16x128xf32>
    %c2 = arith.constant 2 : index
    %c0_6 = arith.constant 0 : index
    %11 = vector.load %arg2[%c2, %c0_6] : memref<8x128xf32, #tpu.memory_space<vmem>>, vector<1x128xf32>
    %12 = vector.broadcast %11 : vector<1x128xf32> to vector<16x128xf32>
    %13 = arith.addf %10, %12 : vector<16x128xf32>
    %14 = vector.extract_strided_slice %13 {offsets = [0, 0], sizes = [16, 64], strides = [1, 1]} : vector<16x128xf32> to vector<16x64xf32>
    %15 = arith.negf %14 : vector<16x64xf32>
    %16 = math.exp %15 : vector<16x64xf32>
    %cst_7 = arith.constant 1.000000e+00 : f32
    %17 = vector.broadcast %cst_7 : f32 to vector<16x64xf32>
    %18 = arith.addf %17, %16 : vector<16x64xf32>
    %19 = arith.divf %17, %18 : vector<16x64xf32>
    %20 = arith.mulf %14, %19 : vector<16x64xf32>
    %21 = vector.extract_strided_slice %13 {offsets = [0, 64], sizes = [16, 64], strides = [1, 1]} : vector<16x128xf32> to vector<16x64xf32>
    %c16 = arith.constant 16 : index
    %c0_8 = arith.constant 0 : index
    %22 = vector.load %arg1[%c16, %c0_8] : memref<288x128xf32, #tpu.memory_space<vmem>>, vector<64x32xf32>
    %cst_9 = arith.constant dense<0.000000e+00> : vector<16x32xf32>
    %23 = tpu.matmul %20, %22, %cst_9 {dimension_numbers = #tpu.dot_dimension_numbers<[1], [0], [0], [1], [0, 0, 1, 1], [], []>} : vector<16x64xf32>, vector<64x32xf32>, vector<16x32xf32> -> vector<16x32xf32>
    %c3 = arith.constant 3 : index
    %c0_10 = arith.constant 0 : index
    %24 = vector.load %arg2[%c3, %c0_10] : memref<8x128xf32, #tpu.memory_space<vmem>>, vector<1x32xf32>
    %25 = vector.broadcast %24 : vector<1x32xf32> to vector<16x32xf32>
    %26 = arith.addf %23, %25 : vector<16x32xf32>
    %27 = arith.negf %26 : vector<16x32xf32>
    %28 = math.exp %27 : vector<16x32xf32>
    %cst_11 = arith.constant 1.000000e+00 : f32
    %29 = vector.broadcast %cst_11 : f32 to vector<16x32xf32>
    %30 = arith.addf %29, %28 : vector<16x32xf32>
    %31 = arith.divf %29, %30 : vector<16x32xf32>
    %32 = arith.mulf %26, %31 : vector<16x32xf32>
    %c80 = arith.constant 80 : index
    %c0_12 = arith.constant 0 : index
    %33 = vector.load %arg1[%c80, %c0_12] : memref<288x128xf32, #tpu.memory_space<vmem>>, vector<32x128xf32>
    %cst_13 = arith.constant dense<0.000000e+00> : vector<16x128xf32>
    %34 = tpu.matmul %32, %33, %cst_13 {dimension_numbers = #tpu.dot_dimension_numbers<[1], [0], [0], [1], [0, 0, 1, 1], [], []>} : vector<16x32xf32>, vector<32x128xf32>, vector<16x128xf32> -> vector<16x128xf32>
    %c4 = arith.constant 4 : index
    %c0_14 = arith.constant 0 : index
    %35 = vector.load %arg2[%c4, %c0_14] : memref<8x128xf32, #tpu.memory_space<vmem>>, vector<1x128xf32>
    %36 = vector.broadcast %35 : vector<1x128xf32> to vector<16x128xf32>
    %37 = arith.addf %34, %36 : vector<16x128xf32>
    %38 = vector.extract_strided_slice %37 {offsets = [0, 0], sizes = [16, 64], strides = [1, 1]} : vector<16x128xf32> to vector<16x64xf32>
    %39 = arith.negf %38 : vector<16x64xf32>
    %40 = math.exp %39 : vector<16x64xf32>
    %cst_15 = arith.constant 1.000000e+00 : f32
    %41 = vector.broadcast %cst_15 : f32 to vector<16x64xf32>
    %42 = arith.addf %41, %40 : vector<16x64xf32>
    %43 = arith.divf %41, %42 : vector<16x64xf32>
    %44 = arith.mulf %38, %43 : vector<16x64xf32>
    %45 = vector.extract_strided_slice %37 {offsets = [0, 64], sizes = [16, 64], strides = [1, 1]} : vector<16x128xf32> to vector<16x64xf32>
    %46 = arith.addf %21, %45 : vector<16x64xf32>
    %47 = arith.negf %46 : vector<16x64xf32>
    %48 = math.exp %47 : vector<16x64xf32>
    %cst_16 = arith.constant 1.000000e+00 : f32
    %49 = vector.broadcast %cst_16 : f32 to vector<16x64xf32>
    %50 = arith.addf %49, %48 : vector<16x64xf32>
    %51 = arith.divf %49, %50 : vector<16x64xf32>
    %52 = arith.mulf %46, %51 : vector<16x64xf32>
    %c112 = arith.constant 112 : index
    %c0_17 = arith.constant 0 : index
    %53 = vector.load %arg1[%c112, %c0_17] : memref<288x128xf32, #tpu.memory_space<vmem>>, vector<64x16xf32>
    %cst_18 = arith.constant dense<0.000000e+00> : vector<16x16xf32>
    %54 = tpu.matmul %44, %53, %cst_18 {dimension_numbers = #tpu.dot_dimension_numbers<[1], [0], [0], [1], [0, 0, 1, 1], [], []>} : vector<16x64xf32>, vector<64x16xf32>, vector<16x16xf32> -> vector<16x16xf32>
    %c5 = arith.constant 5 : index
    %c0_19 = arith.constant 0 : index
    %55 = vector.load %arg2[%c5, %c0_19] : memref<8x128xf32, #tpu.memory_space<vmem>>, vector<1x16xf32>
    %56 = vector.broadcast %55 : vector<1x16xf32> to vector<16x16xf32>
    %57 = arith.addf %54, %56 : vector<16x16xf32>
    %c176 = arith.constant 176 : index
    %c0_20 = arith.constant 0 : index
    %58 = vector.load %arg1[%c176, %c0_20] : memref<288x128xf32, #tpu.memory_space<vmem>>, vector<64x32xf32>
    %cst_21 = arith.constant dense<0.000000e+00> : vector<16x32xf32>
    %59 = tpu.matmul %52, %58, %cst_21 {dimension_numbers = #tpu.dot_dimension_numbers<[1], [0], [0], [1], [0, 0, 1, 1], [], []>} : vector<16x64xf32>, vector<64x32xf32>, vector<16x32xf32> -> vector<16x32xf32>
    %c6 = arith.constant 6 : index
    %c0_22 = arith.constant 0 : index
    %60 = vector.load %arg2[%c6, %c0_22] : memref<8x128xf32, #tpu.memory_space<vmem>>, vector<1x32xf32>
    %61 = vector.broadcast %60 : vector<1x32xf32> to vector<16x32xf32>
    %62 = arith.addf %59, %61 : vector<16x32xf32>
    %63 = arith.negf %62 : vector<16x32xf32>
    %64 = math.exp %63 : vector<16x32xf32>
    %cst_23 = arith.constant 1.000000e+00 : f32
    %65 = vector.broadcast %cst_23 : f32 to vector<16x32xf32>
    %66 = arith.addf %65, %64 : vector<16x32xf32>
    %67 = arith.divf %65, %66 : vector<16x32xf32>
    %68 = arith.mulf %62, %67 : vector<16x32xf32>
    %69 = tpu.concatenate %57, %68 in 1 : vector<16x16xf32>, vector<16x32xf32> -> vector<16x48xf32>
    %c240 = arith.constant 240 : index
    %c0_24 = arith.constant 0 : index
    %70 = vector.load %arg1[%c240, %c0_24] : memref<288x128xf32, #tpu.memory_space<vmem>>, vector<48x16xf32>
    %cst_25 = arith.constant dense<0.000000e+00> : vector<16x16xf32>
    %71 = tpu.matmul %69, %70, %cst_25 {dimension_numbers = #tpu.dot_dimension_numbers<[1], [0], [0], [1], [0, 0, 1, 1], [], []>} : vector<16x48xf32>, vector<48x16xf32>, vector<16x16xf32> -> vector<16x16xf32>
    %c7 = arith.constant 7 : index
    %c0_26 = arith.constant 0 : index
    %72 = vector.load %arg2[%c7, %c0_26] : memref<8x128xf32, #tpu.memory_space<vmem>>, vector<1x16xf32>
    %73 = vector.broadcast %72 : vector<1x16xf32> to vector<16x16xf32>
    %74 = arith.addf %71, %73 : vector<16x16xf32>
    %cst_27 = arith.constant 0.000000e+00 : f32
    %75 = vector.broadcast %cst_27 : f32 to vector<16x16xf32>
    %76 = arith.maximumf %74, %75 : vector<16x16xf32>
    %77 = arith.mulf %74, %8 : vector<16x16xf32>
    %78 = arith.subf %76, %77 : vector<16x16xf32>
    %79 = math.absf %74 : vector<16x16xf32>
    %cst_28 = arith.constant 0.000000e+00 : f32
    %80 = vector.broadcast %cst_28 : f32 to vector<16x16xf32>
    %81 = arith.subf %80, %79 : vector<16x16xf32>
    %cst_29 = arith.constant 0.000000e+00 : f32
    %82 = vector.broadcast %cst_29 : f32 to vector<16x16xf32>
    %83 = arith.maximumf %81, %82 : vector<16x16xf32>
    %84 = vector.broadcast %cst_29 : f32 to vector<16x16xf32>
    %85 = arith.subf %81, %84 : vector<16x16xf32>
    %86 = arith.cmpf one, %85, %85 : vector<16x16xf32>
    %87 = vector.broadcast %cst_29 : f32 to vector<16x16xf32>
    %88 = arith.addf %81, %87 : vector<16x16xf32>
    %89 = math.absf %85 : vector<16x16xf32>
    %cst_30 = arith.constant 0.000000e+00 : f32
    %90 = vector.broadcast %cst_30 : f32 to vector<16x16xf32>
    %91 = arith.subf %90, %89 : vector<16x16xf32>
    %92 = math.exp %91 : vector<16x16xf32>
    %93 = math.log1p %92 : vector<16x16xf32>
    %94 = arith.addf %83, %93 : vector<16x16xf32>
    %95 = arith.select %86, %88, %94 : vector<16x16xi1>, vector<16x16xf32>
    %96 = arith.addf %78, %95 : vector<16x16xf32>
    %97 = tpu.iota {dimensions = array<i32: 1>} : vector<16x16xi32>
    %c8_i32 = arith.constant 8 : i32
    %98 = vector.broadcast %c8_i32 : i32 to vector<16x16xi32>
    %99 = arith.cmpi slt, %97, %98 : vector<16x16xi32>
    %cst_31 = arith.constant 0.000000e+00 : f32
    %100 = vector.broadcast %cst_31 : f32 to vector<16x16xf32>
    %101 = arith.select %99, %96, %100 : vector<16x16xi1>, vector<16x16xf32>
    %102 = vector.shape_cast %101 : vector<16x16xf32> to vector<1x16x16xf32>
    %cst_32 = arith.constant dense<0.000000e+00> : vector<1xf32>
    %103 = vector.multi_reduction <add>, %102, %cst_32 [1, 2] : vector<1x16x16xf32> to vector<1xf32>
    %104 = vector.shape_cast %103 : vector<1xf32> to vector<1x1x1xf32>
    %105 = vector.extract %104[0, 0, 0] : f32 from vector<1x1x1xf32>
    %106 = vector.shape_cast %96 : vector<16x16xf32> to vector<1x16x16xf32>
    %cst_33 = arith.constant dense<0.000000e+00> : vector<1xf32>
    %107 = vector.multi_reduction <add>, %106, %cst_33 [1, 2] : vector<1x16x16xf32> to vector<1xf32>
    %108 = vector.shape_cast %107 : vector<1xf32> to vector<1x1x1xf32>
    %109 = vector.extract %108[0, 0, 0] : f32 from vector<1x1x1xf32>
    %cst_34 = arith.constant 7.812500e-03 : f32
    %110 = arith.mulf %105, %cst_34 : f32
    %111 = arith.subf %109, %105 : f32
    %cst_35 = arith.constant 7.812500e-03 : f32
    %112 = arith.mulf %111, %cst_35 : f32
    %113 = arith.subf %57, %7 : vector<16x16xf32>
    %114 = arith.mulf %113, %113 : vector<16x16xf32>
    %115 = vector.shape_cast %114 : vector<16x16xf32> to vector<1x16x16xf32>
    %cst_36 = arith.constant dense<0.000000e+00> : vector<1xf32>
    %116 = vector.multi_reduction <add>, %115, %cst_36 [1, 2] : vector<1x16x16xf32> to vector<1xf32>
    %117 = vector.shape_cast %116 : vector<1xf32> to vector<1x1x1xf32>
    %118 = vector.extract %117[0, 0, 0] : f32 from vector<1x1x1xf32>
    %cst_37 = arith.constant 3.906250e-03 : f32
    %119 = arith.mulf %118, %cst_37 : f32
    %c0_38 = arith.constant 0 : index
    %c0_39 = arith.constant 0 : index
    %120 = vector.load %arg3[%c0_38, %c0_39] : memref<24x128xf32, #tpu.memory_space<vmem>>, vector<16x128xf32>
    tpu.vector_store %arg3[%c0_38, %c0_39], %6 {strides = array<i32>} : memref<24x128xf32, #tpu.memory_space<vmem>>, vector<16x128xf32>,
    %121 = tpu.iota {dimensions = array<i32: 1>} : vector<8x128xi32>
    %c0_i32 = arith.constant 0 : i32
    %122 = vector.broadcast %c0_i32 : i32 to vector<8x128xi32>
    %123 = arith.cmpi eq, %121, %122 : vector<8x128xi32>
    %cst_40 = arith.constant 0.000000e+00 : f32
    %124 = vector.broadcast %119 : f32 to vector<8x128xf32>
    %125 = vector.broadcast %cst_40 : f32 to vector<8x128xf32>
    %126 = arith.select %123, %124, %125 : vector<8x128xi1>, vector<8x128xf32>
    %c1_i32 = arith.constant 1 : i32
    %127 = vector.broadcast %c1_i32 : i32 to vector<8x128xi32>
    %128 = arith.cmpi eq, %121, %127 : vector<8x128xi32>
    %cst_41 = arith.constant 0.000000e+00 : f32
    %129 = vector.broadcast %110 : f32 to vector<8x128xf32>
    %130 = vector.broadcast %cst_41 : f32 to vector<8x128xf32>
    %131 = arith.select %128, %129, %130 : vector<8x128xi1>, vector<8x128xf32>
    %132 = arith.addf %126, %131 : vector<8x128xf32>
    %c2_i32 = arith.constant 2 : i32
    %133 = vector.broadcast %c2_i32 : i32 to vector<8x128xi32>
    %134 = arith.cmpi eq, %121, %133 : vector<8x128xi32>
    %cst_42 = arith.constant 0.000000e+00 : f32
    %135 = vector.broadcast %112 : f32 to vector<8x128xf32>
    %136 = vector.broadcast %cst_42 : f32 to vector<8x128xf32>
    %137 = arith.select %134, %135, %136 : vector<8x128xi1>, vector<8x128xf32>
    %138 = arith.addf %132, %137 : vector<8x128xf32>
    %c16_43 = arith.constant 16 : index
    %c0_44 = arith.constant 0 : index
    %139 = vector.load %arg3[%c16_43, %c0_44] : memref<24x128xf32, #tpu.memory_space<vmem>>, vector<8x128xf32>
    tpu.vector_store %arg3[%c16_43, %c0_44], %138 {strides = array<i32>} : memref<24x128xf32, #tpu.memory_space<vmem>>, vector<8x128xf32>,
    return
  }
}

</mosaic_0001>

<bundles_post_ra>
// kernel: autoencoder_forward.1
= control target key start
LH: loop header
LB: loop body
LE: loop exit
PB: predicated region body
PF: predicated region fallthrough
CT: control target
= control target key end

     0   :  { %8 = vsyncpa [#allocation3], 0  ;;  %s1134_s12 = smov [#allocation2]   ;;  %s1261_s0 = inlined_call_operand.vmem [shape: f32[16,128], index: 0, kind: input, shape index: {}]   ;;  %s1262_s1 = inlined_call_operand.hbm [shape: f32[288,128], index: 1, kind: input, shape index: {}]   ;;  %s1263_s2 = inlined_call_operand.vmem [shape: f32[8,128], index: 2, kind: input, shape index: {}]   ;;  %s1264_s3 = inlined_call_operand.vmem [shape: f32[24,128], index: 3, kind: output, shape index: {}]  }
   0x1   :  { %s16_s13 = sshll.u32 %s1134_s12, 4  ;;  %s1110_s16 = scalar_lea.hbm %s1262_s1, 4608  ;;  %s17_s13 = int_to_ptr.vmem [resolvable:$true] %s16_s13 }
   0x2   :  { %p1111_p0 = scmp.ne.s32.totalorder %s1262_s1, %s1110_s16  ;;  %p1114_p1 = scmp.lt.u32.totalorder %s1110_s16, %s1262_s1 }
   0x4   :  { %p1116_p2 = pnand %p1114_p1, %p1111_p0 }
   0x6   :  { %1119 = shalt.err (!%p1116_p2)
}
   0x7   :  { %s1120_s21 = scalar_lea.vmem %s17_s13, 4608  ;;  %p1125_p4 = scmp.lt.s32.totalorder %s17_s13, %s17_s13 }
   0x8   :  { %p1121_p3 = scmp.ne.s32.totalorder %s17_s13, %s1120_s21  ;;  %p1126_p5 = scmp.lt.s32.totalorder %s1120_s21, %s1120_s21 }
   0xa   :  { %p1127_p6 = por %p1126_p5, %p1125_p4 }
   0xc   :  { %p1128_p7 = pnand %p1127_p6, %p1121_p3 }
   0xe   :  { %1131 = shalt.err (!%p1128_p7)
}
   0xf   :  { %s1135_s22 = smov 128   ;;  %s1136_s23 = smov 8  }
  0x10   :  { %22 = dma.hbm_to_vmem [thread:$0]  %s1262_s1, 4608, %s17_s13, [#allocation3], %s1135_s22, %s1135_s22, %s1136_s23  }
  0x11   :  { %1132 = dma.done.wait [#allocation3], 4608  }
  0x12   :  { %1133 = vsyncadd [#allocation3], 4294962688  ;;  %v44_v0 = vld [vmem:[#allocation2] sm:$0xff]  ;;  %v45_v1 = vld [vmem:[#allocation2 + $0x8] sm:$0xff]  ;;  %vm51_vm0 = vcmask 130048   ;;  %vm160_vm1 = vcmask 523264  }
  0x13   :  { %v1175_v2 = vld [vmem:[%s1261_s0] sm:$0xff]  ;;  %v978_v3 = vpack.c.bf16 %v45_v1, %v44_v0  ;;  %v1180_v4 = vld [vmem:[%s1261_s0 + $0x8] sm:$0xff]  ;;  %v147_v11 = vld [vmem:[#allocation2 + $0x10] sm:$0xff]  ;;  %vm265_vm2 = vcmask 261120   ;;  %s1137_s15 = smov 64   ;;  %s1138_s18 = smov 112  }
  0x14   :  { %v810_v5 = vld [vmem:[%s1263_s2] ss:$0 sm:$0xff]  ;;  %v811_v6 = vld [vmem:[%s1263_s2 + $0x1] ss:$0 sm:$0xff]  ;;  %v148_v12 = vld [vmem:[#allocation2 + $0x18] sm:$0xff]  ;;  %s1139_s19 = smov 16  }
  0x15   :  { %v35_v7 = vmul.f32 %v810_v5, %v1175_v2  ;;  %v36_v8 = vmul.f32 %v810_v5, %v1180_v4  ;;  %979 = vmatprep.subr.bf16.mxu1 %v978_v3  ;;  %v982_v13 = vpack.c.bf16 %v148_v12, %v147_v11  ;;  %v149_v14 = vld [vmem:[#allocation2 + $0x20] sm:$0xff]  ;;  %v150_v15 = vld [vmem:[#allocation2 + $0x28] sm:$0xff]  ;;  %v151_v17 = vld [vmem:[#allocation2 + $0x30] sm:$0xff]  ;;  %vm604_vm3 = vcmask 392192  }
  0x16   :  { %981 = vmatpush3.bf16.msra.mxu1 %v978_v3  ;;  %v986_v16 = vpack.c.bf16 %v150_v15, %v149_v14  ;;  %v152_v18 = vld [vmem:[#allocation2 + $0x38] sm:$0xff]  ;;  %v153_v20 = vld [vmem:[#allocation2 + $0x40] sm:$0xff]  ;;  %v154_v21 = vld [vmem:[#allocation2 + $0x48] sm:$0xff] }
  0x17   :  { %v1190_v9 = vadd.f32 %v811_v6, %v35_v7  ;;  %v1192_v10 = vadd.f32 %v811_v6, %v36_v8  ;;  %983 = vmatprep.subr.bf16.mxu1 %v982_v13  ;;  %v990_v19 = vpack.c.bf16 %v152_v18, %v151_v17  ;;  %v994_v22 = vpack.c.bf16 %v154_v21, %v153_v20  ;;  %v812_v23 = vld [vmem:[%s1263_s2 + $0x2] ss:$0 sm:$0xff]  ;;  %v256_v38 = vld [vmem:[#allocation2 + $0x50] sm:$0xff]  ;;  %v257_v39 = vld [vmem:[#allocation2 + $0x58] sm:$0xff] }
  0x18   :  { %v998_v40 = vpack.c.bf16 %v257_v39, %v256_v38  ;;  %v258_v41 = vld [vmem:[#allocation2 + $0x60] sm:$0xff]  ;;  %v259_v42 = vld [vmem:[#allocation2 + $0x68] sm:$0xff]  ;;  %v377_v59 = vld [vmem:[#allocation2 + $0x70] sm:$0xff] }
  0x19   :  { %892 = vmatprep.mubr.msk.f32.mxu1 %vm51_vm0, %v1190_v9  ;;  %791 = vst [vmem:[%s1264_s3] sm:$0xff] %v1190_v9  ;;  %792 = vst [vmem:[%s1264_s3 + $0x8] sm:$0xff] %v1192_v10  ;;  %v1002_v43 = vpack.c.bf16 %v259_v42, %v258_v41  ;;  %v817_v44 = vld [vmem:[%s1263_s2 + $0x3] ss:$0 sm:$0xff]  ;;  %v378_v60 = vld [vmem:[#allocation2 + $0x78] sm:$0xff] }
  0x1a   :  { %893 = vmatmul.mubr.msk.f32.vlgmr.msra.gmra.mrb[0].mxu1 %vm51_vm0, %v1192_v10  ;;  %999 = vmatprep.subr.bf16.mxu0 %v998_v40  ;;  %v1006_v61 = vpack.c.bf16 %v378_v60, %v377_v59  ;;  %v379_v62 = vld [vmem:[#allocation2 + $0x80] sm:$0xff]  ;;  %v380_v63 = vld [vmem:[#allocation2 + $0x88] sm:$0xff]  ;;  %v381_v1 = vld [vmem:[#allocation2 + $0x90] sm:$0xff] }
  0x1b   :  { %985 = vmatpush3.bf16.msra.mxu1 %v982_v13  ;;  %1001 = vmatpush3.bf16.msra.mxu0 %v998_v40  ;;  %v1010_v0 = vpack.c.bf16 %v380_v63, %v379_v62  ;;  %v382_v3 = vld [vmem:[#allocation2 + $0x98] sm:$0xff]  ;;  %v383_v6 = vld [vmem:[#allocation2 + $0xa0] sm:$0xff]  ;;  %v384_v7 = vld [vmem:[#allocation2 + $0xa8] sm:$0xff] }
  0x1c   :  { %987 = vmatprep.subr.bf16.mxu1 %v986_v16  ;;  %1003 = vmatprep.subr.bf16.mxu0 %v1002_v43  ;;  %v1014_v5 = vpack.c.bf16 %v382_v3, %v381_v1  ;;  %v1018_v8 = vpack.c.bf16 %v384_v7, %v383_v6  ;;  %v471_v11 = vld [vmem:[#allocation2 + $0xb0] sm:$0xff]  ;;  %v472_v12 = vld [vmem:[#allocation2 + $0xb8] sm:$0xff]  ;;  %v473_v13 = vld [vmem:[#allocation2 + $0xc0] sm:$0xff] }
  0x1d   :  { %v1022_v14 = vpack.c.bf16 %v472_v12, %v471_v11  ;;  %v474_v15 = vld [vmem:[#allocation2 + $0xc8] sm:$0xff]  ;;  %v475_v17 = vld [vmem:[#allocation2 + $0xd0] sm:$0xff]  ;;  %v476_v18 = vld [vmem:[#allocation2 + $0xd8] sm:$0xff] }
  0x1e   :  { %v822_v20 = vld [vmem:[%s1263_s2 + $0x4] ss:$0 sm:$0xff]  ;;  %v478_v40 = vld [vmem:[#allocation2 + $0xe8] sm:$0xff]  ;;  %v832_v60 = vld [vmem:[%s1263_s2 + $0x6] ss:$0 sm:$0xff] }
  0x1f   :  { %989 = vmatpush3.bf16.msra.mxu1 %v986_v16  ;;  %1005 = vmatpush3.bf16.msra.mxu0 %v1002_v43  ;;  %v1026_v16 = vpack.c.bf16 %v474_v15, %v473_v13  ;;  %v477_v39 = vld [vmem:[#allocation2 + $0xe0] sm:$0xff]  ;;  %v597_v11 = vld [vmem:[#allocation2 + $0x110] sm:$0xff]  ;;  %v598_v12 = vld [vmem:[#allocation2 + $0x118] sm:$0xff] }
  0x20   :  { %991 = vmatprep.subr.bf16.mxu1 %v990_v19  ;;  %1007 = vmatprep.subr.bf16.mxu0 %v1006_v61  ;;  %v1034_v42 = vpack.c.bf16 %v478_v40, %v477_v39  ;;  %v1046_v13 = vpack.c.bf16 %v598_v12, %v597_v11 }
  0x23   :  { %993 = vmatpush3.bf16.msra.mxu1 %v990_v19  ;;  %v1030_v19 = vpack.c.bf16 %v476_v18, %v475_v17  ;;  %v829_v18 = vld [vmem:[%s1263_s2 + $0x5] ss:$0 sm:$0xff] }
  0x24   :  { %995 = vmatprep.subr.bf16.mxu1 %v994_v22 }
  0x27   :  { %997 = vmatpush3.bf16.msra.mxu1 %v994_v22 }
  0x28   :  { %1023 = vmatprep.subr.bf16.mxu1 %v1022_v14 }
  0xed   :  { %v894_v24 = vpop.f32.mrb[0].mxu1 }
  0xee   :  { %v1209_v25 = vadd.f32 %v894_v24, %v812_v23  ;;  %v124_v26 = vpop.f32.mrb[1].mxu1 }
  0xef   :  { %v1211_v27 = vadd.f32 %v812_v23, %v124_v26 }
  0xf0   :  { %v816_v28 = vmul.f32 -1.442695, %v1209_v25 }
  0xf1   :  { %v815_v29 = vmul.f32 -1.442695, %v1211_v27 }
  0xf2   :  { %1062 = vpow2.f32 %v816_v28 }
  0xf3   :  { %1064 = vpow2.f32 %v815_v29 }
  0xfc   :  { %v1063_v30 = vpop.eup %1062 }
  0xfd   :  { %v1065_v31 = vpop.eup %1064  ;;  %v140_v32 = vadd.f32 1.0, %v1063_v30 }
  0xfe   :  { %v139_v33 = vadd.f32 1.0, %v1065_v31 }
  0xff   :  { %1066 = vrcp.f32 %v140_v32 }
 0x100   :  { %1068 = vrcp.f32 %v139_v33 }
 0x109   :  { %v1067_v34 = vpop.eup %1066 }
 0x10a   :  { %v1069_v35 = vpop.eup %1068  ;;  %v146_v37 = vmul.f32 %v1067_v34, %v1209_v25 }
 0x10b   :  { %v145_v36 = vmul.f32 %v1069_v35, %v1211_v27 }
 0x10d   :  { %911 = vmatprep.mubr.msk.f32.mxu1 %vm160_vm1, %v145_v36 }
 0x10e   :  { %912 = vmatmul.mubr.msk.f32.vlgmr.msra.gmra.mrb[2].mxu1 %vm160_vm1, %v146_v37 }
 0x10f   :  { %1025 = vmatpush3.bf16.msra.mxu1 %v1022_v14 }
 0x110   :  { %1027 = vmatprep.subr.bf16.mxu1 %v1026_v16 }
 0x113   :  { %1029 = vmatpush3.bf16.msra.mxu1 %v1026_v16 }
 0x114   :  { %1031 = vmatprep.subr.bf16.mxu1 %v1030_v19 }
 0x117   :  { %1033 = vmatpush3.bf16.msra.mxu1 %v1030_v19 }
 0x118   :  { %1035 = vmatprep.subr.bf16.mxu1 %v1034_v42 }
 0x11b   :  { %1037 = vmatpush3.bf16.msra.mxu1 %v1034_v42 }
 0x1e1   :  { %v913_v45 = vpop.f32.mrb[2].mxu1 }
 0x1e2   :  { %v239_v46 = vadd.f32 %v913_v45, %v817_v44  ;;  %v233_v47 = vpop.f32.mrb[3].mxu1 }
 0x1e3   :  { %v234_v48 = vadd.f32 %v817_v44, %v233_v47 }
 0x1e4   :  { %v821_v49 = vmul.f32 -1.442695, %v239_v46 }
 0x1e5   :  { %v820_v50 = vmul.f32 -1.442695, %v234_v48 }
 0x1e6   :  { %1070 = vpow2.f32 %v821_v49 }
 0x1e7   :  { %1072 = vpow2.f32 %v820_v50 }
 0x1f0   :  { %v1071_v51 = vpop.eup %1070 }
 0x1f1   :  { %v1073_v52 = vpop.eup %1072  ;;  %v249_v53 = vadd.f32 1.0, %v1071_v51 }
 0x1f2   :  { %v248_v54 = vadd.f32 1.0, %v1073_v52 }
 0x1f3   :  { %1074 = vrcp.f32 %v249_v53 }
 0x1f4   :  { %1076 = vrcp.f32 %v248_v54  ;;  %v593_v54 = vld [vmem:[#allocation2 + $0xf0] sm:$0xff] }
 0x1fd   :  { %v1075_v55 = vpop.eup %1074 }
 0x1fe   :  { %v1077_v56 = vpop.eup %1076  ;;  %v255_v58 = vmul.f32 %v1075_v55, %v239_v46  ;;  %v594_v55 = vld [vmem:[#allocation2 + $0xf8] sm:$0xff] }
 0x1ff   :  { %v254_v57 = vmul.f32 %v1077_v56, %v234_v48  ;;  %v595_v56 = vld [vmem:[#allocation2 + $0x100] sm:$0xff] }
 0x201   :  { %922 = vmatprep.mubr.msk.f32.mxu0 %vm265_vm2, %v254_v57  ;;  %v1038_v57 = vpack.c.bf16 %v594_v55, %v593_v54 }
 0x202   :  { %923 = vmatmul.mubr.msk.f32.vlgmr.msra.gmra.mrb[0].mxu0 %vm265_vm2, %v255_v58  ;;  %v596_v58 = vld [vmem:[#allocation2 + $0x108] sm:$0xff] }
 0x203   :  { %1009 = vmatpush3.bf16.msra.mxu0 %v1006_v61  ;;  %v1042_v59 = vpack.c.bf16 %v596_v58, %v595_v56 }
 0x204   :  { %1011 = vmatprep.subr.bf16.mxu0 %v1010_v0 }
 0x207   :  { %1013 = vmatpush3.bf16.msra.mxu0 %v1010_v0 }
 0x208   :  { %1015 = vmatprep.subr.bf16.mxu0 %v1014_v5 }
 0x20b   :  { %1017 = vmatpush3.bf16.msra.mxu0 %v1014_v5 }
 0x20c   :  { %1019 = vmatprep.subr.bf16.mxu0 %v1018_v8 }
 0x20f   :  { %1021 = vmatpush3.bf16.msra.mxu0 %v1018_v8 }
 0x210   :  { %1039 = vmatprep.subr.bf16.mxu0 %v1038_v57 }
 0x2d5   :  { %v924_v21 = vpop.f32.mrb[0].mxu0 }
 0x2d6   :  { %v344_v22 = vadd.f32 %v924_v21, %v822_v20  ;;  %v338_v23 = vpop.f32.mrb[1].mxu0 }
 0x2d7   :  { %v339_v24 = vadd.f32 %v822_v20, %v338_v23 }
 0x2d8   :  { %v826_v26 = vmul.f32 -1.442695, %v344_v22  ;;  %v362_v28 = vadd.f32 %v344_v22, %v1209_v25 }
 0x2d9   :  { %v825_v29 = vmul.f32 -1.442695, %v339_v24  ;;  %v361_v30 = vadd.f32 %v339_v24, %v1211_v27 }
 0x2da   :  { %1078 = vpow2.f32 %v826_v26  ;;  %v828_v31 = vmul.f32 -1.442695, %v362_v28 }
 0x2db   :  { %1080 = vpow2.f32 %v825_v29  ;;  %v827_v32 = vmul.f32 -1.442695, %v361_v30 }
 0x2dc   :  { %1082 = vpow2.f32 %v828_v31 }
 0x2dd   :  { %1084 = vpow2.f32 %v827_v32 }
 0x2e4   :  { %v1079_v33 = vpop.eup %1078 }
 0x2e5   :  { %v1081_v34 = vpop.eup %1080  ;;  %v354_v35 = vadd.f32 1.0, %v1079_v33 }
 0x2e6   :  { %v1083_v36 = vpop.eup %1082  ;;  %v353_v37 = vadd.f32 1.0, %v1081_v34 }
 0x2e7   :  { %v1085_v38 = vpop.eup %1084  ;;  %1086 = vrcp.f32 %v354_v35  ;;  %v370_v41 = vadd.f32 1.0, %v1083_v36 }
 0x2e8   :  { %1088 = vrcp.f32 %v353_v37  ;;  %v369_v25 = vadd.f32 1.0, %v1085_v38 }
 0x2ea   :  { %1090 = vrcp.f32 %v369_v25 }
 0x2eb   :  { %1092 = vrcp.f32 %v370_v41 }
 0x2f1   :  { %v1087_v27 = vpop.eup %1086 }
 0x2f2   :  { %v1089_v43 = vpop.eup %1088  ;;  %v360_v46 = vmul.f32 %v1087_v27, %v344_v22 }
 0x2f3   :  { %v359_v44 = vmul.f32 %v1089_v43, %v339_v24  ;;  %v837_v24 = vld [vmem:[%s1263_s2 + $0x7] ss:$0 sm:$0xff] }
 0x2f4   :  { %v1091_v45 = vpop.eup %1090 }
 0x2f5   :  { %941 = vmatprep.mubr.msk.f32.mxu0 %vm160_vm1, %v359_v44  ;;  %v375_v47 = vmul.f32 %v1091_v45, %v361_v30  ;;  %v1093_v48 = vpop.eup %1092  ;;  %v742_v44 = vlaneseq }
 0x2f6   :  { %942 = vmatmul.mubr.msk.f32.vlgmr.msra.gmra.mrb[2].mxu0 %vm160_vm1, %v360_v46  ;;  %v376_v49 = vmul.f32 %v1093_v48, %v362_v28 }
 0x2f7   :  { %486 = vrot.lane.b32.xlu0 %v375_v47, %s1137_s15  ;;  %1041 = vmatpush3.bf16.msra.mxu0 %v1038_v57  ;;  %v1244_v54 = vand.u32 127, %v742_v44 }
 0x2f8   :  { %1043 = vmatprep.subr.bf16.mxu0 %v1042_v59 }
 0x2f9   :  { %vm744_vm8 = vcmp.lt.s32.totalorder %v1244_v54, 8  ;;  %vm793_vm9 = vcmp.eq.s32.totalorder %v1244_v54, 0  ;;  %vm796_vm10 = vcmp.eq.s32.totalorder %v1244_v54, 1  ;;  %vm800_vm11 = vcmp.eq.s32.totalorder %v1244_v54, 2 }
 0x2fb   :  { %488 = vrot.lane.b32.xlu0 %v376_v49, %s1137_s15  ;;  %1045 = vmatpush3.bf16.msra.mxu0 %v1042_v59 }
 0x2fc   :  { %1047 = vmatprep.subr.bf16.mxu0 %v1046_v13 }
 0x2ff   :  { %1049 = vmatpush3.bf16.msra.mxu0 %v1046_v13  ;;  %690 = vrot.lane.b32.xlu0 %v1175_v2, %s1138_s18 }
 0x369   :  { %v487_v50 = vpop.permute.xlu0 %486 }
 0x36a   :  { %960 = vmatprep.mubr.msk.f32.mxu1 %vm160_vm1, %v487_v50 }
 0x36d   :  { %v489_v51 = vpop.permute.xlu0 %488 }
 0x36e   :  { %961 = vmatmul.mubr.msk.f32.vlgmr.msra.gmra.mrb[4].mxu1 %vm160_vm1, %v489_v51 }
 0x371   :  { %v691_v47 = vpop.permute.xlu0 %690 }
 0x3c9   :  { %v943_v52 = vpop.f32.mrb[2].mxu0 }
 0x3ca   :  { %v462_v53 = vpop.f32.mrb[3].mxu0  ;;  %v468_v2 = vadd.f32 %v943_v52, %v829_v18 }
 0x3cb   :  { %v463_v19 = vadd.f32 %v829_v18, %v462_v53 }
 0x441   :  { %v962_v61 = vpop.f32.mrb[4].mxu1 }
 0x442   :  { %v566_v62 = vadd.f32 %v962_v61, %v832_v60  ;;  %v560_v63 = vpop.f32.mrb[5].mxu1 }
 0x443   :  { %v561_v0 = vadd.f32 %v832_v60, %v560_v63 }
 0x444   :  { %v836_v1 = vmul.f32 -1.442695, %v566_v62 }
 0x445   :  { %v835_v3 = vmul.f32 -1.442695, %v561_v0 }
 0x446   :  { %1094 = vpow2.f32 %v836_v1  ;;  %v775_v1 = vsub.f32 %v468_v2, %v1192_v10 }
 0x447   :  { %1096 = vpow2.f32 %v835_v3 }
 0x450   :  { %v1095_v5 = vpop.eup %1094 }
 0x451   :  { %v1097_v6 = vpop.eup %1096  ;;  %v576_v7 = vadd.f32 1.0, %v1095_v5 }
 0x452   :  { %v575_v8 = vadd.f32 1.0, %v1097_v6  ;;  %v774_v6 = vsub.f32 %v463_v19, %v1190_v9 }
 0x454   :  { %1098 = vrcp.f32 %v575_v8 }
 0x455   :  { %1100 = vrcp.f32 %v576_v7 }
 0x45e   :  { %v1099_v14 = vpop.eup %1098 }
 0x45f   :  { %v581_v15 = vmul.f32 %v1099_v14, %v561_v0  ;;  %v1101_v16 = vpop.eup %1100 }
 0x460   :  { %v582_v17 = vmul.f32 %v1101_v16, %v566_v62  ;;  %v777_v16 = vmul.f32 %v775_v1, %v775_v1 }
 0x461   :  { %585 = vrot.lane.b32.xlu1 %v581_v15, %s1139_s19 }
 0x465   :  { %587 = vrot.lane.b32.xlu1 %v582_v17, %s1139_s19  ;;  %v776_v17 = vmul.f32 %v774_v6, %v774_v6 }
 0x469   :  { %692 = vrot.lane.b32.xlu1 %v1180_v4, %s1138_s18 }
 0x4d3   :  { %v586_v20 = vpop.permute.xlu1 %585 }
 0x4d4   :  { %v591_v21 = vsel %vm51_vm0, %v463_v19, %v586_v20 }
 0x4d5   :  { %975 = vmatprep.mubr.msk.f32.mxu0 %vm604_vm3, %v591_v21 }
 0x4d7   :  { %v588_v22 = vpop.permute.xlu1 %587 }
 0x4d8   :  { %v592_v23 = vsel %vm51_vm0, %v468_v2, %v588_v22 }
 0x4d9   :  { %976 = vmatmul.mubr.msk.f32.vlgmr.msra.gmra.mrb[4].mxu0 %vm604_vm3, %v592_v23  ;;  %v778_v23 = vsel %vm51_vm0, %v776_v17, 0.0 }
 0x4db   :  { %v693_v45 = vpop.permute.xlu1 %692 }
 0x5ac   :  { %v977_v4 = vpop.f32.mrb[4].mxu0 }
 0x5ad   :  { %v683_v26 = vadd.f32 %v977_v4, %v837_v24  ;;  %v677_v28 = vpop.f32.mrb[5].mxu0 }
 0x5ae   :  { %v678_v29 = vadd.f32 %v837_v24, %v677_v28  ;;  %v779_v24 = vsel %vm51_vm0, %v777_v16, 0.0 }
 0x5af   :  { %v701_v30 = vand.u32 2147483647, %v683_v26  ;;  %v687_v52 = vmax.f32 %v683_v26, 0.0  ;;  %v697_v53 = vmul.f32 %v693_v45, %v683_v26  ;;  %v780_v4 = vadd.f32 %v779_v24, %v778_v23 }
 0x5b0   :  { %v700_v31 = vand.u32 2147483647, %v678_v29  ;;  %v686_v56 = vmax.f32 %v678_v29, 0.0  ;;  %v696_v57 = vmul.f32 %v691_v47, %v678_v29 }
 0x5b1   :  { %v703_v32 = vsub.f32 0.0, %v701_v30  ;;  %v699_v7 = vsub.f32 %v687_v52, %v697_v53 }
 0x5b2   :  { %v702_v33 = vsub.f32 0.0, %v700_v31  ;;  %v698_v11 = vsub.f32 %v686_v56, %v696_v57 }
 0x5b3   :  { %v711_v34 = vand.u32 2147483647, %v703_v32  ;;  %v705_v60 = vmax.f32 %v703_v32, 0.0  ;;  %vm707_vm6 = vcmp.ne.f32.partialorder %v703_v32, %v703_v32 }
 0x5b4   :  { %v710_v35 = vand.u32 2147483647, %v702_v33  ;;  %v704_v63 = vmax.f32 %v702_v33, 0.0  ;;  %vm706_vm7 = vcmp.ne.f32.partialorder %v702_v33, %v702_v33 }
 0x5b5   :  { %v713_v36 = vsub.f32 0.0, %v711_v34 }
 0x5b6   :  { %v712_v37 = vsub.f32 0.0, %v710_v35 }
 0x5b7   :  { %v716_v38 = vmul.f32 1.442695, %v713_v36 }
 0x5b8   :  { %v714_v39 = vmul.f32 1.442695, %v712_v37 }
 0x5b9   :  { %1102 = vpow2.f32 %v716_v38 }
 0x5ba   :  { %1104 = vpow2.f32 %v714_v39 }
 0x5c3   :  { %v1103_v40 = vpop.eup %1102 }
 0x5c4   :  { %v1105_v41 = vpop.eup %1104  ;;  %v727_v25 = vadd.f32 1.0, %v1103_v40  ;;  %v730_v27 = vmul.f32 -0.5, %v1103_v40  ;;  %v733_v49 = vand.u32 2147483647, %v1103_v40 }
 0x5c5   :  { %v718_v42 = vadd.f32 1.0, %v1105_v41  ;;  %v721_v43 = vmul.f32 -0.5, %v1105_v41  ;;  %v724_v50 = vand.u32 2147483647, %v1105_v41 }
 0x5c6   :  { %1106 = vlog2.f32 %v727_v25  ;;  %v731_v46 = vadd.f32 1.0, %v730_v27  ;;  %vm734_vm4 = vcmp.lt.f32.partialorder %v733_v49, 0.0004427343 }
 0x5c7   :  { %1108 = vlog2.f32 %v718_v42  ;;  %v722_v48 = vadd.f32 1.0, %v721_v43  ;;  %vm725_vm5 = vcmp.lt.f32.partialorder %v724_v50, 0.0004427343 }
 0x5c8   :  { %v732_v59 = vmul.f32 %v1103_v40, %v731_v46 }
 0x5c9   :  { %v723_v62 = vmul.f32 %v1105_v41, %v722_v48 }
 0x5d0   :  { %v1107_v51 = vpop.eup %1106 }
 0x5d1   :  { %v1109_v55 = vpop.eup %1108  ;;  %v729_v58 = vmul.f32 0.6931472, %v1107_v51 }
 0x5d2   :  { %v720_v61 = vmul.f32 0.6931472, %v1109_v55 }
 0x5d3   :  { %v735_v0 = vsel %vm734_vm4, %v732_v59, %v729_v58 }
 0x5d4   :  { %v726_v3 = vsel %vm725_vm5, %v723_v62, %v720_v61  ;;  %v737_v5 = vadd.f32 %v735_v0, %v705_v60 }
 0x5d5   :  { %v736_v8 = vadd.f32 %v726_v3, %v704_v63 }
 0x5d6   :  { %v739_v12 = vsel %vm707_vm6, %v703_v32, %v737_v5 }
 0x5d7   :  { %v738_v13 = vsel %vm706_vm7, %v702_v33, %v736_v8  ;;  %v741_v14 = vadd.f32 %v739_v12, %v699_v7 }
 0x5d8   :  { %v740_v15 = vadd.f32 %v738_v13, %v698_v11 }
 0x5d9   :  { %v760_v18 = vsel %vm51_vm0, %v741_v14, 0.0  ;;  %v746_v10 = vsel %vm744_vm8, %v741_v14, 0.0 }
 0x5da   :  { %v759_v20 = vsel %vm51_vm0, %v740_v15, 0.0  ;;  %v745_v21 = vsel %vm744_vm8, %v740_v15, 0.0  ;;  %v748_v9 = vsel %vm51_vm0, %v746_v10, 0.0 }
 0x5db   :  { %v761_v19 = vadd.f32 %v760_v18, %v759_v20  ;;  %v747_v2 = vsel %vm51_vm0, %v745_v21, 0.0 }
 0x5dc   :  { %v749_v22 = vadd.f32 %v748_v9, %v747_v2 }
 0x5dd   :  { %762 = vadd.xlane.f32.xlu1 %v761_v19 }
 0x5de   :  { %750 = vadd.xlane.f32.xlu0 %v749_v22 }
 0x5e2   :  { %781 = vadd.xlane.f32.xlu0 %v780_v4 }
 0x66a   :  { %v763_v26 = vpop.xlane.xlu1 %762 }
 0x66b   :  { %v764_v28 = vrot.slane %v763_v26, 4  ;;  %v751_v29 = vpop.xlane.xlu0 %750 }
 0x66c   :  { %v752_v30 = vrot.slane %v751_v29, 4 }
 0x66d   :  { %v765_v31 = vadd.f32 %v764_v28, %v763_v26 }
 0x66e   :  { %v753_v32 = vadd.f32 %v752_v30, %v751_v29 }
 0x66f   :  { %v766_v33 = vrot.slane %v765_v31, 2  ;;  %v782_v34 = vpop.xlane.xlu0 %781 }
 0x670   :  { %v754_v35 = vrot.slane %v753_v32, 2  ;;  %v783_v36 = vrot.slane %v782_v34, 4 }
 0x671   :  { %v767_v37 = vadd.f32 %v766_v33, %v765_v31 }
 0x672   :  { %v784_v38 = vadd.f32 %v783_v36, %v782_v34  ;;  %v755_v39 = vadd.f32 %v754_v35, %v753_v32 }
 0x673   :  { %v768_v40 = vrot.slane %v767_v37, 1 }
 0x674   :  { %v785_v41 = vrot.slane %v784_v38, 2  ;;  %v756_v25 = vrot.slane %v755_v39, 1 }
 0x675   :  { %v769_v42 = vadd.f32 %v768_v40, %v767_v37 }
 0x676   :  { %v786_v27 = vadd.f32 %v785_v41, %v784_v38  ;;  %v757_v43 = vadd.f32 %v756_v25, %v755_v39 }
 0x678   :  { %1050 = vpush %v757_v43  ;;  %v787_v44 = vrot.slane %v786_v27, 1 }
 0x679   :  { %1052 = vpush %v769_v42 }
 0x67a   :  { %v788_v45 = vadd.f32 %v787_v44, %v786_v27 }
 0x67c   :  { %1054 = vpush %v788_v45 }
 0x6a9   :  { %s1051_s2 = spop %1050 }
 0x6aa   :  { %s771_s24 = smul.f32 0.0078125, %s1051_s2  ;;  %s1053_s25 = spop %1052 }
 0x6ab   :  { %s772_s26 = ssub.f32 %s1053_s25, %s1051_s2 }
 0x6ac   :  { %v797_v46 = vstv %s771_s24 }
 0x6ad   :  { %s773_s27 = smul.f32 0.0078125, %s772_s26  ;;  %s1055_s28 = spop %1054  ;;  %v798_v50 = vsel %vm796_vm10, %v797_v46, 0.0 }
 0x6ae   :  { %s790_s29 = smul.f32 0.00390625, %s1055_s28 }
 0x6af   :  { %v801_v47 = vstv %s773_s27 }
 0x6b0   :  { %v794_v48 = vstv %s790_s29  ;;  %v802_v52 = vsel %vm800_vm11, %v801_v47, 0.0 }
 0x6b1   :  { %v795_v49 = vsel %vm793_vm9, %v794_v48, 0.0 }
 0x6b2   :  { %v799_v51 = vadd.f32 %v798_v50, %v795_v49 }
 0x6b4   :  { %v803_v53 = vadd.f32 %v802_v52, %v799_v51 }
 0x6b6   :  { %804 = vst [vmem:[%s1264_s3 + $0x10] sm:$0xff] %v803_v53 }
 0x6b7   :  { %809 = vsyncpa [#allocation3], 1 }

</bundles_post_ra>
